<compile_context>
chip_gen: v6e
topology: v6e:2x2x1
jax: 0.10.0
libtpu: 0.0.40
codegen_flags: <defaults>
</compile_context>

<pallas_src>
import functools
import math

import jax
import jax.numpy as jnp
from jax import lax
from jax.experimental import pallas as pl
from jax.experimental.pallas import tpu as pltpu


# ----------------------------------------------------------------------------
# Fused bidirectional LSTM layer: per-step input projection + recurrence for
# both directions in one kernel, one merged time loop.
#   x_ref   : (T, B, F)   time-major layer input (VMEM resident)
#   wih_ref : (2, F, 4H)  input weights (fwd, bwd), gate order i|f|g|o
#   whh_ref : (2, H, 4H)  recurrent weights (fwd, bwd)
#   b_ref   : (2, 1, 4H)  combined biases b_ih + b_hh (fwd, bwd)
#   out_ref : (T, B, 2H)  fwd hidden -> lanes [0:H], bwd hidden -> lanes [H:2H]
# ----------------------------------------------------------------------------
def _apply_gates(z, c_prev, H):
    # PyTorch gate order: i, f, g, o
    i = jax.nn.sigmoid(z[:, 0 * H:1 * H])
    f = jax.nn.sigmoid(z[:, 1 * H:2 * H])
    g = jnp.tanh(z[:, 2 * H:3 * H])
    o = jax.nn.sigmoid(z[:, 3 * H:4 * H])
    c = f * c_prev + i * g
    h = o * jnp.tanh(c)
    return h, c


def _bilstm_kernel(x_ref, wih_ref, whh_ref, b_ref, out_ref, *, T, H):
    B = x_ref.shape[1]
    h0 = jnp.zeros((B, H), jnp.float32)
    c0 = jnp.zeros((B, H), jnp.float32)

    def step(s, carry):
        h_f, c_f, h_b, c_b = carry
        tb = T - 1 - s                      # backward chain's time index

        x_f = x_ref[s]                      # (B, F)
        x_b = x_ref[tb]                     # (B, F)

        # Input projections (independent of h -> overlap with recurrent dots).
        z_f = (jnp.dot(x_f, wih_ref[0], preferred_element_type=jnp.float32)
               + jnp.dot(h_f, whh_ref[0], preferred_element_type=jnp.float32)
               + b_ref[0])
        z_b = (jnp.dot(x_b, wih_ref[1], preferred_element_type=jnp.float32)
               + jnp.dot(h_b, whh_ref[1], preferred_element_type=jnp.float32)
               + b_ref[1])

        h_f, c_f = _apply_gates(z_f, c_f, H)
        h_b, c_b = _apply_gates(z_b, c_b, H)

        # Write each direction straight into its lane-half of the output.
        out_ref[s, :, 0:H] = h_f
        out_ref[tb, :, H:2 * H] = h_b
        return h_f, c_f, h_b, c_b

    lax.fori_loop(0, T, step, (h0, c0, h0, c0))


def bilstm_layer(x_tm, wih_stack, whh_stack, bias_stack):
    """One fused bidirectional LSTM layer.  x_tm: (T, B, F) -> (T, B, 2H)."""
    T, B, F = x_tm.shape
    H = whh_stack.shape[1]
    vmem_spec = pl.BlockSpec(memory_space=pltpu.MemorySpace.VMEM)
    return pl.pallas_call(
        functools.partial(_bilstm_kernel, T=T, H=H),
        out_shape=jax.ShapeDtypeStruct((T, B, 2 * H), jnp.float32),
        in_specs=[vmem_spec, vmem_spec, vmem_spec, vmem_spec],
        out_specs=vmem_spec,
        compiler_params=pltpu.CompilerParams(
            vmem_limit_bytes=64 * 1024 * 1024),
    )(x_tm, wih_stack, whh_stack, bias_stack)


def bidir_lstm(x_btf, lstm_params):
    """Multi-layer bidirectional LSTM. x_btf: (B, T, F) -> (B, T, 2H)."""
    x_tm = jnp.transpose(x_btf, (1, 0, 2))          # single transpose in
    for layer in lstm_params:
        x_tm = bilstm_layer(x_tm, layer["wih"], layer["whh"], layer["bias"])
    # TODO(synk): the batch-first transpose back could be folded into the heads
    # kernel's out_specs (secondary win); kept as one XLA transpose here.
    return jnp.transpose(x_tm, (1, 0, 2))           # single transpose out


# ----------------------------------------------------------------------------
# Fused heads + loss kernel: the mean and log_var FC chains are combined into a
# single lane-concatenated chain (layer 0 shares the input -> concat outputs;
# deeper layers -> block-diagonal weights), then the negative-Gaussian-log-
# likelihood loss is computed in the same pass.  rnn_out is read from HBM once.
# ----------------------------------------------------------------------------
def _heads_loss_kernel(*refs, n_layers, d_out):
    x_ref, tgt_ref = refs[0], refs[1]
    w_refs = refs[2:2 + 2 * n_layers]
    mean_ref, logvar_ref, loss_ref = refs[2 + 2 * n_layers:]

    y = x_ref[...]
    for l in range(n_layers):
        w = w_refs[2 * l][...]
        b = w_refs[2 * l + 1][...]
        y = jnp.dot(y, w, preferred_element_type=jnp.float32) + b
        if l < n_layers - 1:
            y = jnp.maximum(y, 0.0)                  # ReLU between layers

    mean = y[:, :d_out]
    log_var = y[:, d_out:]

    eps = jnp.float32(1e-5)
    log2pi = jnp.float32(math.log(2.0 * math.pi))
    diff = tgt_ref[...] - mean
    # eps placement matches the reference: 1 / (exp(log_var) + eps).
    # approx=True routes the reciprocal to the EUP (tiny numeric deviation).
    inv_var = pl.reciprocal(jnp.exp(log_var) + eps, approx=True)
    loss = 0.5 * (log2pi + log_var + diff * diff * inv_var)   # = -likelihood

    mean_ref[...] = mean
    logvar_ref[...] = log_var
    loss_ref[...] = loss


def _block_diag(a, b):
    top = jnp.concatenate([a, jnp.zeros((a.shape[0], b.shape[1]), jnp.float32)], axis=1)
    bot = jnp.concatenate([jnp.zeros((b.shape[0], a.shape[1]), jnp.float32), b], axis=1)
    return jnp.concatenate([top, bot], axis=0)


def heads_and_loss(rnn_out_bt, target_bt, mean_fc, log_var_fc, *, tile_rows=1024):
    """rnn_out_bt: (B, T, Din); target_bt: (B, T, Dout)."""
    B, T, Din = rnn_out_bt.shape
    Dout = mean_fc[-1][0].shape[1]
    N = B * T
    x = rnn_out_bt.reshape(N, Din)
    tgt = target_bt.reshape(N, Dout)
    tn = N if N <= tile_rows else tile_rows
    n_layers = len(mean_fc)

    # Combine the two heads into one FC chain.
    weight_args, weight_specs = [], []
    for l, ((wm, bm), (wv, bv)) in enumerate(zip(mean_fc, log_var_fc)):
        if l == 0:
            w = jnp.concatenate([wm, wv], axis=1)        # shared input
        else:
            w = _block_diag(wm, wv)                      # independent paths
        b = jnp.concatenate([bm, bv], axis=1)
        weight_args += [w, b]
        weight_specs += [
            pl.BlockSpec(w.shape, lambda i: (0, 0)),
            pl.BlockSpec(b.shape, lambda i: (0, 0)),
        ]

    out_shape = jax.ShapeDtypeStruct((N, Dout), jnp.float32)
    out_spec = pl.BlockSpec((tn, Dout), lambda i: (i, 0))

    mean, log_var, loss = pl.pallas_call(
        functools.partial(_heads_loss_kernel, n_layers=n_layers, d_out=Dout),
        out_shape=(out_shape, out_shape, out_shape),
        grid=(pl.cdiv(N, tn),),
        in_specs=[
            pl.BlockSpec((tn, Din), lambda i: (i, 0)),
            pl.BlockSpec((tn, Dout), lambda i: (i, 0)),
        ] + weight_specs,
        out_specs=(out_spec, out_spec, out_spec),
        compiler_params=pltpu.CompilerParams(
            dimension_semantics=("parallel",),
            vmem_limit_bytes=64 * 1024 * 1024),
    )(x, tgt, *weight_args)

    return (mean.reshape(B, T, Dout),
            log_var.reshape(B, T, Dout),
            loss.reshape(B, T, Dout))


# ----------------------------------------------------------------------------
# Parameter construction (deterministic, PyTorch-style uniform init), converted
# to the fused layouts the kernels consume.
# ----------------------------------------------------------------------------
def _uniform(key, shape, bound):
    return jax.random.uniform(key, shape, jnp.float32, -bound, bound)


def init_params(key, input_size, rnn_hidden, rnn_layers, fc_sizes):
    H = rnn_hidden
    k_lstm = 1.0 / math.sqrt(H)
    lstm_params = []
    for layer in range(rnn_layers):
        in_f = input_size if layer == 0 else 2 * H
        wih_dirs, whh_dirs, bias_dirs = [], [], []
        for _direction in ("fwd", "bwd"):
            key, k1, k2, k3, k4 = jax.random.split(key, 5)
            w_ih = _uniform(k1, (4 * H, in_f), k_lstm)   # PyTorch layout (4H, F)
            w_hh = _uniform(k2, (4 * H, H), k_lstm)      # (4H, H)
            b_ih = _uniform(k3, (4 * H,), k_lstm)
            b_hh = _uniform(k4, (4 * H,), k_lstm)
            wih_dirs.append(w_ih.T)                      # (F, 4H), gate cols i|f|g|o
            whh_dirs.append(w_hh.T)                      # (H, 4H)
            bias_dirs.append(b_ih + b_hh)                # combined bias, added once
        lstm_params.append({
            "wih": jnp.stack(wih_dirs, axis=0),                      # (2, F, 4H)
            "whh": jnp.stack(whh_dirs, axis=0),                      # (2, H, 4H)
            "bias": jnp.stack(bias_dirs, axis=0).reshape(2, 1, 4 * H),  # (2, 1, 4H)
        })

    def init_fc(key):
        fc = []
        for din, dout in zip(fc_sizes[:-1], fc_sizes[1:]):
            key, k1, k2 = jax.random.split(key, 3)
            bound = 1.0 / math.sqrt(din)
            w = _uniform(k1, (din, dout), bound)
            b = _uniform(k2, (1, dout), bound)
            fc.append((w, b))
        return key, fc

    key, mean_fc = init_fc(key)
    key, log_var_fc = init_fc(key)
    return {"lstm": lstm_params, "mean_fc": mean_fc, "log_var_fc": log_var_fc}


# ----------------------------------------------------------------------------
# Decoder forward (matches Decoder.forward semantics, loss_type='likelihood').
# ----------------------------------------------------------------------------
def decoder_forward(params, sampled_h, target_feats):
    rnn_out = bidir_lstm(sampled_h, params["lstm"])        # (B, T, 2H)
    mean, log_var, loss = heads_and_loss(
        rnn_out, target_feats, params["mean_fc"], params["log_var_fc"])
    return {"mean": mean, "log_var": log_var, "losses": {"recon_loss": loss}}


if __name__ == "__main__":
    B, T = 2, 8
    input_size = 16
    rnn_hidden = 16
    rnn_layers = 2
    fc_sizes = [2 * rnn_hidden, 32, 16]   # FC input must be 2*rnn_hidden (bidirectional)

    key = jax.random.PRNGKey(0)
    key, kx, kt = jax.random.split(key, 3)
    sampled_h = jax.random.normal(kx, (B, T, input_size), jnp.float32)
    target_feats = jax.random.normal(kt, (B, T, fc_sizes[-1]), jnp.float32)

    params = init_params(key, input_size, rnn_hidden, rnn_layers, fc_sizes)

    fwd = jax.jit(decoder_forward)
    out = fwd(params, sampled_h, target_feats)
    jax.block_until_ready(out)

    assert out["mean"].shape == (B, T, fc_sizes[-1])
    assert out["log_var"].shape == (B, T, fc_sizes[-1])
    assert out["losses"]["recon_loss"].shape == (B, T, fc_sizes[-1])
    assert all(bool(jnp.all(jnp.isfinite(v))) for v in
               (out["mean"], out["log_var"], out["losses"]["recon_loss"]))
    print("KERNEL_OK")
</pallas_src>

<mosaic_0001>
module attributes {stable_mosaic.version = 11 : i64} {
  func.func @_bilstm_kernel(%arg0: memref<8x2x16xf32, #tpu.memory_space<vmem>>, %arg1: memref<2x16x64xf32, #tpu.memory_space<vmem>>, %arg2: memref<2x16x64xf32, #tpu.memory_space<vmem>>, %arg3: memref<2x1x64xf32, #tpu.memory_space<vmem>>, %arg4: memref<8x2x32xf32, #tpu.memory_space<vmem>>) attributes {dimension_semantics = [], scalar_prefetch = 0 : i64, scratch_operands = 0 : i64, tpu.core_type = #tpu.core_type<tc>} {
    %cst = arith.constant 0.000000e+00 : f32
    %0 = vector.broadcast %cst : f32 to vector<2x16xf32>
    %cst_0 = arith.constant 0.000000e+00 : f32
    %1 = vector.broadcast %cst_0 : f32 to vector<2x16xf32>
    %c0_i32 = arith.constant 0 : i32
    %c8_i32 = arith.constant 8 : i32
    %2 = arith.addi %c0_i32, %c8_i32 : i32
    %c1_i32 = arith.constant 1 : i32
    %3:4 = scf.for %arg5 = %c0_i32 to %2 step %c1_i32 iter_args(%arg6 = %0, %arg7 = %1, %arg8 = %0, %arg9 = %1) -> (vector<2x16xf32>, vector<2x16xf32>, vector<2x16xf32>, vector<2x16xf32>)  : i32 {
      %c7_i32 = arith.constant 7 : i32
      %4 = arith.subi %c7_i32, %arg5 : i32
      %5 = arith.index_cast %arg5 : i32 to index
      %c0 = arith.constant 0 : index
      %c0_2 = arith.constant 0 : index
      %6 = vector.load %arg0[%5, %c0, %c0_2] : memref<8x2x16xf32, #tpu.memory_space<vmem>>, vector<1x2x16xf32>
      %7 = vector.shape_cast %6 : vector<1x2x16xf32> to vector<2x16xf32>
      %8 = arith.index_cast %4 : i32 to index
      %c0_3 = arith.constant 0 : index
      %c0_4 = arith.constant 0 : index
      %9 = vector.load %arg0[%8, %c0_3, %c0_4] : memref<8x2x16xf32, #tpu.memory_space<vmem>>, vector<1x2x16xf32>
      %10 = vector.shape_cast %9 : vector<1x2x16xf32> to vector<2x16xf32>
      %c0_5 = arith.constant 0 : index
      %c0_6 = arith.constant 0 : index
      %c0_7 = arith.constant 0 : index
      %11 = vector.load %arg1[%c0_5, %c0_6, %c0_7] : memref<2x16x64xf32, #tpu.memory_space<vmem>>, vector<1x16x64xf32>
      %12 = vector.shape_cast %11 : vector<1x16x64xf32> to vector<16x64xf32>
      %cst_8 = arith.constant dense<0.000000e+00> : vector<2x64xf32>
      %13 = tpu.matmul %7, %12, %cst_8 {dimension_numbers = #tpu.dot_dimension_numbers<[1], [0], [0], [1], [0, 0, 1, 1], [], []>} : vector<2x16xf32>, vector<16x64xf32>, vector<2x64xf32> -> vector<2x64xf32>
      %c0_9 = arith.constant 0 : index
      %c0_10 = arith.constant 0 : index
      %c0_11 = arith.constant 0 : index
      %14 = vector.load %arg2[%c0_9, %c0_10, %c0_11] : memref<2x16x64xf32, #tpu.memory_space<vmem>>, vector<1x16x64xf32>
      %15 = vector.shape_cast %14 : vector<1x16x64xf32> to vector<16x64xf32>
      %cst_12 = arith.constant dense<0.000000e+00> : vector<2x64xf32>
      %16 = tpu.matmul %arg6, %15, %cst_12 {dimension_numbers = #tpu.dot_dimension_numbers<[1], [0], [0], [1], [0, 0, 1, 1], [], []>} : vector<2x16xf32>, vector<16x64xf32>, vector<2x64xf32> -> vector<2x64xf32>
      %17 = arith.addf %13, %16 : vector<2x64xf32>
      %c0_13 = arith.constant 0 : index
      %c0_14 = arith.constant 0 : index
      %c0_15 = arith.constant 0 : index
      %18 = vector.load %arg3[%c0_13, %c0_14, %c0_15] : memref<2x1x64xf32, #tpu.memory_space<vmem>>, vector<1x1x64xf32>
      %19 = vector.shape_cast %18 : vector<1x1x64xf32> to vector<1x64xf32>
      %20 = vector.broadcast %19 : vector<1x64xf32> to vector<2x64xf32>
      %21 = arith.addf %17, %20 : vector<2x64xf32>
      %c1 = arith.constant 1 : index
      %c0_16 = arith.constant 0 : index
      %c0_17 = arith.constant 0 : index
      %22 = vector.load %arg1[%c1, %c0_16, %c0_17] : memref<2x16x64xf32, #tpu.memory_space<vmem>>, vector<1x16x64xf32>
      %23 = vector.shape_cast %22 : vector<1x16x64xf32> to vector<16x64xf32>
      %cst_18 = arith.constant dense<0.000000e+00> : vector<2x64xf32>
      %24 = tpu.matmul %10, %23, %cst_18 {dimension_numbers = #tpu.dot_dimension_numbers<[1], [0], [0], [1], [0, 0, 1, 1], [], []>} : vector<2x16xf32>, vector<16x64xf32>, vector<2x64xf32> -> vector<2x64xf32>
      %c1_19 = arith.constant 1 : index
      %c0_20 = arith.constant 0 : index
      %c0_21 = arith.constant 0 : index
      %25 = vector.load %arg2[%c1_19, %c0_20, %c0_21] : memref<2x16x64xf32, #tpu.memory_space<vmem>>, vector<1x16x64xf32>
      %26 = vector.shape_cast %25 : vector<1x16x64xf32> to vector<16x64xf32>
      %cst_22 = arith.constant dense<0.000000e+00> : vector<2x64xf32>
      %27 = tpu.matmul %arg8, %26, %cst_22 {dimension_numbers = #tpu.dot_dimension_numbers<[1], [0], [0], [1], [0, 0, 1, 1], [], []>} : vector<2x16xf32>, vector<16x64xf32>, vector<2x64xf32> -> vector<2x64xf32>
      %28 = arith.addf %24, %27 : vector<2x64xf32>
      %c1_23 = arith.constant 1 : index
      %c0_24 = arith.constant 0 : index
      %c0_25 = arith.constant 0 : index
      %29 = vector.load %arg3[%c1_23, %c0_24, %c0_25] : memref<2x1x64xf32, #tpu.memory_space<vmem>>, vector<1x1x64xf32>
      %30 = vector.shape_cast %29 : vector<1x1x64xf32> to vector<1x64xf32>
      %31 = vector.broadcast %30 : vector<1x64xf32> to vector<2x64xf32>
      %32 = arith.addf %28, %31 : vector<2x64xf32>
      %33 = vector.extract_strided_slice %21 {offsets = [0, 0], sizes = [2, 16], strides = [1, 1]} : vector<2x64xf32> to vector<2x16xf32>
      %34 = arith.negf %33 : vector<2x16xf32>
      %35 = math.exp %34 : vector<2x16xf32>
      %cst_26 = arith.constant 1.000000e+00 : f32
      %36 = vector.broadcast %cst_26 : f32 to vector<2x16xf32>
      %37 = arith.addf %36, %35 : vector<2x16xf32>
      %38 = arith.divf %36, %37 : vector<2x16xf32>
      %39 = vector.extract_strided_slice %21 {offsets = [0, 16], sizes = [2, 16], strides = [1, 1]} : vector<2x64xf32> to vector<2x16xf32>
      %40 = arith.negf %39 : vector<2x16xf32>
      %41 = math.exp %40 : vector<2x16xf32>
      %cst_27 = arith.constant 1.000000e+00 : f32
      %42 = vector.broadcast %cst_27 : f32 to vector<2x16xf32>
      %43 = arith.addf %42, %41 : vector<2x16xf32>
      %44 = arith.divf %42, %43 : vector<2x16xf32>
      %45 = vector.extract_strided_slice %21 {offsets = [0, 32], sizes = [2, 16], strides = [1, 1]} : vector<2x64xf32> to vector<2x16xf32>
      %46 = math.tanh %45 : vector<2x16xf32>
      %47 = vector.extract_strided_slice %21 {offsets = [0, 48], sizes = [2, 16], strides = [1, 1]} : vector<2x64xf32> to vector<2x16xf32>
      %48 = arith.negf %47 : vector<2x16xf32>
      %49 = math.exp %48 : vector<2x16xf32>
      %cst_28 = arith.constant 1.000000e+00 : f32
      %50 = vector.broadcast %cst_28 : f32 to vector<2x16xf32>
      %51 = arith.addf %50, %49 : vector<2x16xf32>
      %52 = arith.divf %50, %51 : vector<2x16xf32>
      %53 = arith.mulf %44, %arg7 : vector<2x16xf32>
      %54 = arith.mulf %38, %46 : vector<2x16xf32>
      %55 = arith.addf %53, %54 : vector<2x16xf32>
      %56 = math.tanh %55 : vector<2x16xf32>
      %57 = arith.mulf %52, %56 : vector<2x16xf32>
      %58 = vector.extract_strided_slice %32 {offsets = [0, 0], sizes = [2, 16], strides = [1, 1]} : vector<2x64xf32> to vector<2x16xf32>
      %59 = arith.negf %58 : vector<2x16xf32>
      %60 = math.exp %59 : vector<2x16xf32>
      %cst_29 = arith.constant 1.000000e+00 : f32
      %61 = vector.broadcast %cst_29 : f32 to vector<2x16xf32>
      %62 = arith.addf %61, %60 : vector<2x16xf32>
      %63 = arith.divf %61, %62 : vector<2x16xf32>
      %64 = vector.extract_strided_slice %32 {offsets = [0, 16], sizes = [2, 16], strides = [1, 1]} : vector<2x64xf32> to vector<2x16xf32>
      %65 = arith.negf %64 : vector<2x16xf32>
      %66 = math.exp %65 : vector<2x16xf32>
      %cst_30 = arith.constant 1.000000e+00 : f32
      %67 = vector.broadcast %cst_30 : f32 to vector<2x16xf32>
      %68 = arith.addf %67, %66 : vector<2x16xf32>
      %69 = arith.divf %67, %68 : vector<2x16xf32>
      %70 = vector.extract_strided_slice %32 {offsets = [0, 32], sizes = [2, 16], strides = [1, 1]} : vector<2x64xf32> to vector<2x16xf32>
      %71 = math.tanh %70 : vector<2x16xf32>
      %72 = vector.extract_strided_slice %32 {offsets = [0, 48], sizes = [2, 16], strides = [1, 1]} : vector<2x64xf32> to vector<2x16xf32>
      %73 = arith.negf %72 : vector<2x16xf32>
      %74 = math.exp %73 : vector<2x16xf32>
      %cst_31 = arith.constant 1.000000e+00 : f32
      %75 = vector.broadcast %cst_31 : f32 to vector<2x16xf32>
      %76 = arith.addf %75, %74 : vector<2x16xf32>
      %77 = arith.divf %75, %76 : vector<2x16xf32>
      %78 = arith.mulf %69, %arg9 : vector<2x16xf32>
      %79 = arith.mulf %63, %71 : vector<2x16xf32>
      %80 = arith.addf %78, %79 : vector<2x16xf32>
      %81 = math.tanh %80 : vector<2x16xf32>
      %82 = arith.mulf %77, %81 : vector<2x16xf32>
      %83 = arith.index_cast %arg5 : i32 to index
      %c0_32 = arith.constant 0 : index
      %c0_33 = arith.constant 0 : index
      %84 = vector.load %arg4[%83, %c0_32, %c0_33] : memref<8x2x32xf32, #tpu.memory_space<vmem>>, vector<1x2x16xf32>
      %85 = vector.shape_cast %84 : vector<1x2x16xf32> to vector<2x16xf32>
      %86 = vector.shape_cast %57 : vector<2x16xf32> to vector<1x2x16xf32>
      tpu.vector_store %arg4[%83, %c0_32, %c0_33], %86 {strides = array<i32>} : memref<8x2x32xf32, #tpu.memory_space<vmem>>, vector<1x2x16xf32>,
      %87 = arith.index_cast %4 : i32 to index
      %c0_34 = arith.constant 0 : index
      %c16 = arith.constant 16 : index
      %88 = vector.load %arg4[%87, %c0_34, %c16] : memref<8x2x32xf32, #tpu.memory_space<vmem>>, vector<1x2x16xf32>
      %89 = vector.shape_cast %88 : vector<1x2x16xf32> to vector<2x16xf32>
      %90 = vector.shape_cast %82 : vector<2x16xf32> to vector<1x2x16xf32>
      tpu.vector_store %arg4[%87, %c0_34, %c16], %90 {strides = array<i32>} : memref<8x2x32xf32, #tpu.memory_space<vmem>>, vector<1x2x16xf32>,
      scf.yield %57, %55, %82, %80 : vector<2x16xf32>, vector<2x16xf32>, vector<2x16xf32>, vector<2x16xf32>
    }
    %c8_i32_1 = arith.constant 8 : i32
    return
  }
}

module attributes {stable_mosaic.version = 11 : i64} {
  func.func @_bilstm_kernel(%arg0: memref<8x2x32xf32, #tpu.memory_space<vmem>>, %arg1: memref<2x32x64xf32, #tpu.memory_space<vmem>>, %arg2: memref<2x16x64xf32, #tpu.memory_space<vmem>>, %arg3: memref<2x1x64xf32, #tpu.memory_space<vmem>>, %arg4: memref<8x2x32xf32, #tpu.memory_space<vmem>>) attributes {dimension_semantics = [], scalar_prefetch = 0 : i64, scratch_operands = 0 : i64, tpu.core_type = #tpu.core_type<tc>} {
    %cst = arith.constant 0.000000e+00 : f32
    %0 = vector.broadcast %cst : f32 to vector<2x16xf32>
    %cst_0 = arith.constant 0.000000e+00 : f32
    %1 = vector.broadcast %cst_0 : f32 to vector<2x16xf32>
    %c0_i32 = arith.constant 0 : i32
    %c8_i32 = arith.constant 8 : i32
    %2 = arith.addi %c0_i32, %c8_i32 : i32
    %c1_i32 = arith.constant 1 : i32
    %3:4 = scf.for %arg5 = %c0_i32 to %2 step %c1_i32 iter_args(%arg6 = %0, %arg7 = %1, %arg8 = %0, %arg9 = %1) -> (vector<2x16xf32>, vector<2x16xf32>, vector<2x16xf32>, vector<2x16xf32>)  : i32 {
      %c7_i32 = arith.constant 7 : i32
      %4 = arith.subi %c7_i32, %arg5 : i32
      %5 = arith.index_cast %arg5 : i32 to index
      %c0 = arith.constant 0 : index
      %c0_2 = arith.constant 0 : index
      %6 = vector.load %arg0[%5, %c0, %c0_2] : memref<8x2x32xf32, #tpu.memory_space<vmem>>, vector<1x2x32xf32>
      %7 = vector.shape_cast %6 : vector<1x2x32xf32> to vector<2x32xf32>
      %8 = arith.index_cast %4 : i32 to index
      %c0_3 = arith.constant 0 : index
      %c0_4 = arith.constant 0 : index
      %9 = vector.load %arg0[%8, %c0_3, %c0_4] : memref<8x2x32xf32, #tpu.memory_space<vmem>>, vector<1x2x32xf32>
      %10 = vector.shape_cast %9 : vector<1x2x32xf32> to vector<2x32xf32>
      %c0_5 = arith.constant 0 : index
      %c0_6 = arith.constant 0 : index
      %c0_7 = arith.constant 0 : index
      %11 = vector.load %arg1[%c0_5, %c0_6, %c0_7] : memref<2x32x64xf32, #tpu.memory_space<vmem>>, vector<1x32x64xf32>
      %12 = vector.shape_cast %11 : vector<1x32x64xf32> to vector<32x64xf32>
      %cst_8 = arith.constant dense<0.000000e+00> : vector<2x64xf32>
      %13 = tpu.matmul %7, %12, %cst_8 {dimension_numbers = #tpu.dot_dimension_numbers<[1], [0], [0], [1], [0, 0, 1, 1], [], []>} : vector<2x32xf32>, vector<32x64xf32>, vector<2x64xf32> -> vector<2x64xf32>
      %c0_9 = arith.constant 0 : index
      %c0_10 = arith.constant 0 : index
      %c0_11 = arith.constant 0 : index
      %14 = vector.load %arg2[%c0_9, %c0_10, %c0_11] : memref<2x16x64xf32, #tpu.memory_space<vmem>>, vector<1x16x64xf32>
      %15 = vector.shape_cast %14 : vector<1x16x64xf32> to vector<16x64xf32>
      %cst_12 = arith.constant dense<0.000000e+00> : vector<2x64xf32>
      %16 = tpu.matmul %arg6, %15, %cst_12 {dimension_numbers = #tpu.dot_dimension_numbers<[1], [0], [0], [1], [0, 0, 1, 1], [], []>} : vector<2x16xf32>, vector<16x64xf32>, vector<2x64xf32> -> vector<2x64xf32>
      %17 = arith.addf %13, %16 : vector<2x64xf32>
      %c0_13 = arith.constant 0 : index
      %c0_14 = arith.constant 0 : index
      %c0_15 = arith.constant 0 : index
      %18 = vector.load %arg3[%c0_13, %c0_14, %c0_15] : memref<2x1x64xf32, #tpu.memory_space<vmem>>, vector<1x1x64xf32>
      %19 = vector.shape_cast %18 : vector<1x1x64xf32> to vector<1x64xf32>
      %20 = vector.broadcast %19 : vector<1x64xf32> to vector<2x64xf32>
      %21 = arith.addf %17, %20 : vector<2x64xf32>
      %c1 = arith.constant 1 : index
      %c0_16 = arith.constant 0 : index
      %c0_17 = arith.constant 0 : index
      %22 = vector.load %arg1[%c1, %c0_16, %c0_17] : memref<2x32x64xf32, #tpu.memory_space<vmem>>, vector<1x32x64xf32>
      %23 = vector.shape_cast %22 : vector<1x32x64xf32> to vector<32x64xf32>
      %cst_18 = arith.constant dense<0.000000e+00> : vector<2x64xf32>
      %24 = tpu.matmul %10, %23, %cst_18 {dimension_numbers = #tpu.dot_dimension_numbers<[1], [0], [0], [1], [0, 0, 1, 1], [], []>} : vector<2x32xf32>, vector<32x64xf32>, vector<2x64xf32> -> vector<2x64xf32>
      %c1_19 = arith.constant 1 : index
      %c0_20 = arith.constant 0 : index
      %c0_21 = arith.constant 0 : index
      %25 = vector.load %arg2[%c1_19, %c0_20, %c0_21] : memref<2x16x64xf32, #tpu.memory_space<vmem>>, vector<1x16x64xf32>
      %26 = vector.shape_cast %25 : vector<1x16x64xf32> to vector<16x64xf32>
      %cst_22 = arith.constant dense<0.000000e+00> : vector<2x64xf32>
      %27 = tpu.matmul %arg8, %26, %cst_22 {dimension_numbers = #tpu.dot_dimension_numbers<[1], [0], [0], [1], [0, 0, 1, 1], [], []>} : vector<2x16xf32>, vector<16x64xf32>, vector<2x64xf32> -> vector<2x64xf32>
      %28 = arith.addf %24, %27 : vector<2x64xf32>
      %c1_23 = arith.constant 1 : index
      %c0_24 = arith.constant 0 : index
      %c0_25 = arith.constant 0 : index
      %29 = vector.load %arg3[%c1_23, %c0_24, %c0_25] : memref<2x1x64xf32, #tpu.memory_space<vmem>>, vector<1x1x64xf32>
      %30 = vector.shape_cast %29 : vector<1x1x64xf32> to vector<1x64xf32>
      %31 = vector.broadcast %30 : vector<1x64xf32> to vector<2x64xf32>
      %32 = arith.addf %28, %31 : vector<2x64xf32>
      %33 = vector.extract_strided_slice %21 {offsets = [0, 0], sizes = [2, 16], strides = [1, 1]} : vector<2x64xf32> to vector<2x16xf32>
      %34 = arith.negf %33 : vector<2x16xf32>
      %35 = math.exp %34 : vector<2x16xf32>
      %cst_26 = arith.constant 1.000000e+00 : f32
      %36 = vector.broadcast %cst_26 : f32 to vector<2x16xf32>
      %37 = arith.addf %36, %35 : vector<2x16xf32>
      %38 = arith.divf %36, %37 : vector<2x16xf32>
      %39 = vector.extract_strided_slice %21 {offsets = [0, 16], sizes = [2, 16], strides = [1, 1]} : vector<2x64xf32> to vector<2x16xf32>
      %40 = arith.negf %39 : vector<2x16xf32>
      %41 = math.exp %40 : vector<2x16xf32>
      %cst_27 = arith.constant 1.000000e+00 : f32
      %42 = vector.broadcast %cst_27 : f32 to vector<2x16xf32>
      %43 = arith.addf %42, %41 : vector<2x16xf32>
      %44 = arith.divf %42, %43 : vector<2x16xf32>
      %45 = vector.extract_strided_slice %21 {offsets = [0, 32], sizes = [2, 16], strides = [1, 1]} : vector<2x64xf32> to vector<2x16xf32>
      %46 = math.tanh %45 : vector<2x16xf32>
      %47 = vector.extract_strided_slice %21 {offsets = [0, 48], sizes = [2, 16], strides = [1, 1]} : vector<2x64xf32> to vector<2x16xf32>
      %48 = arith.negf %47 : vector<2x16xf32>
      %49 = math.exp %48 : vector<2x16xf32>
      %cst_28 = arith.constant 1.000000e+00 : f32
      %50 = vector.broadcast %cst_28 : f32 to vector<2x16xf32>
      %51 = arith.addf %50, %49 : vector<2x16xf32>
      %52 = arith.divf %50, %51 : vector<2x16xf32>
      %53 = arith.mulf %44, %arg7 : vector<2x16xf32>
      %54 = arith.mulf %38, %46 : vector<2x16xf32>
      %55 = arith.addf %53, %54 : vector<2x16xf32>
      %56 = math.tanh %55 : vector<2x16xf32>
      %57 = arith.mulf %52, %56 : vector<2x16xf32>
      %58 = vector.extract_strided_slice %32 {offsets = [0, 0], sizes = [2, 16], strides = [1, 1]} : vector<2x64xf32> to vector<2x16xf32>
      %59 = arith.negf %58 : vector<2x16xf32>
      %60 = math.exp %59 : vector<2x16xf32>
      %cst_29 = arith.constant 1.000000e+00 : f32
      %61 = vector.broadcast %cst_29 : f32 to vector<2x16xf32>
      %62 = arith.addf %61, %60 : vector<2x16xf32>
      %63 = arith.divf %61, %62 : vector<2x16xf32>
      %64 = vector.extract_strided_slice %32 {offsets = [0, 16], sizes = [2, 16], strides = [1, 1]} : vector<2x64xf32> to vector<2x16xf32>
      %65 = arith.negf %64 : vector<2x16xf32>
      %66 = math.exp %65 : vector<2x16xf32>
      %cst_30 = arith.constant 1.000000e+00 : f32
      %67 = vector.broadcast %cst_30 : f32 to vector<2x16xf32>
      %68 = arith.addf %67, %66 : vector<2x16xf32>
      %69 = arith.divf %67, %68 : vector<2x16xf32>
      %70 = vector.extract_strided_slice %32 {offsets = [0, 32], sizes = [2, 16], strides = [1, 1]} : vector<2x64xf32> to vector<2x16xf32>
      %71 = math.tanh %70 : vector<2x16xf32>
      %72 = vector.extract_strided_slice %32 {offsets = [0, 48], sizes = [2, 16], strides = [1, 1]} : vector<2x64xf32> to vector<2x16xf32>
      %73 = arith.negf %72 : vector<2x16xf32>
      %74 = math.exp %73 : vector<2x16xf32>
      %cst_31 = arith.constant 1.000000e+00 : f32
      %75 = vector.broadcast %cst_31 : f32 to vector<2x16xf32>
      %76 = arith.addf %75, %74 : vector<2x16xf32>
      %77 = arith.divf %75, %76 : vector<2x16xf32>
      %78 = arith.mulf %69, %arg9 : vector<2x16xf32>
      %79 = arith.mulf %63, %71 : vector<2x16xf32>
      %80 = arith.addf %78, %79 : vector<2x16xf32>
      %81 = math.tanh %80 : vector<2x16xf32>
      %82 = arith.mulf %77, %81 : vector<2x16xf32>
      %83 = arith.index_cast %arg5 : i32 to index
      %c0_32 = arith.constant 0 : index
      %c0_33 = arith.constant 0 : index
      %84 = vector.load %arg4[%83, %c0_32, %c0_33] : memref<8x2x32xf32, #tpu.memory_space<vmem>>, vector<1x2x16xf32>
      %85 = vector.shape_cast %84 : vector<1x2x16xf32> to vector<2x16xf32>
      %86 = vector.shape_cast %57 : vector<2x16xf32> to vector<1x2x16xf32>
      tpu.vector_store %arg4[%83, %c0_32, %c0_33], %86 {strides = array<i32>} : memref<8x2x32xf32, #tpu.memory_space<vmem>>, vector<1x2x16xf32>,
      %87 = arith.index_cast %4 : i32 to index
      %c0_34 = arith.constant 0 : index
      %c16 = arith.constant 16 : index
      %88 = vector.load %arg4[%87, %c0_34, %c16] : memref<8x2x32xf32, #tpu.memory_space<vmem>>, vector<1x2x16xf32>
      %89 = vector.shape_cast %88 : vector<1x2x16xf32> to vector<2x16xf32>
      %90 = vector.shape_cast %82 : vector<2x16xf32> to vector<1x2x16xf32>
      tpu.vector_store %arg4[%87, %c0_34, %c16], %90 {strides = array<i32>} : memref<8x2x32xf32, #tpu.memory_space<vmem>>, vector<1x2x16xf32>,
      scf.yield %57, %55, %82, %80 : vector<2x16xf32>, vector<2x16xf32>, vector<2x16xf32>, vector<2x16xf32>
    }
    %c8_i32_1 = arith.constant 8 : i32
    return
  }
}

module attributes {stable_mosaic.version = 11 : i64} {
  func.func @_heads_loss_kernel(%arg0: i32, %arg1: memref<16x32xf32, #tpu.memory_space<vmem>>, %arg2: memref<16x16xf32, #tpu.memory_space<vmem>>, %arg3: memref<32x64xf32, #tpu.memory_space<vmem>>, %arg4: memref<1x64xf32, #tpu.memory_space<vmem>>, %arg5: memref<64x32xf32, #tpu.memory_space<vmem>>, %arg6: memref<1x32xf32, #tpu.memory_space<vmem>>, %arg7: memref<16x16xf32, #tpu.memory_space<vmem>>, %arg8: memref<16x16xf32, #tpu.memory_space<vmem>>, %arg9: memref<16x16xf32, #tpu.memory_space<vmem>>) attributes {dimension_semantics = [#tpu.dimension_semantics<parallel>], iteration_bounds = array<i64: 1>, scalar_prefetch = 0 : i64, scratch_operands = 0 : i64, tpu.core_type = #tpu.core_type<tc>, window_params = [{transform_indices = @transform_0, window_bounds = array<i64: 16, 32>}, {transform_indices = @transform_1, window_bounds = array<i64: 16, 16>}, {pipeline_mode = #tpu.pipeline_mode<synchronous>, transform_indices = @transform_2, window_bounds = array<i64: 32, 64>}, {pipeline_mode = #tpu.pipeline_mode<synchronous>, transform_indices = @transform_3, window_bounds = array<i64: 1, 64>}, {pipeline_mode = #tpu.pipeline_mode<synchronous>, transform_indices = @transform_4, window_bounds = array<i64: 64, 32>}, {pipeline_mode = #tpu.pipeline_mode<synchronous>, transform_indices = @transform_5, window_bounds = array<i64: 1, 32>}, {transform_indices = @transform_6, window_bounds = array<i64: 16, 16>}, {transform_indices = @transform_7, window_bounds = array<i64: 16, 16>}, {transform_indices = @transform_8, window_bounds = array<i64: 16, 16>}]} {
    %c0 = arith.constant 0 : index
    %c0_0 = arith.constant 0 : index
    %0 = vector.load %arg1[%c0, %c0_0] : memref<16x32xf32, #tpu.memory_space<vmem>>, vector<16x32xf32>
    %c0_1 = arith.constant 0 : index
    %c0_2 = arith.constant 0 : index
    %1 = vector.load %arg3[%c0_1, %c0_2] : memref<32x64xf32, #tpu.memory_space<vmem>>, vector<32x64xf32>
    %c0_3 = arith.constant 0 : index
    %c0_4 = arith.constant 0 : index
    %2 = vector.load %arg4[%c0_3, %c0_4] : memref<1x64xf32, #tpu.memory_space<vmem>>, vector<1x64xf32>
    %cst = arith.constant dense<0.000000e+00> : vector<16x64xf32>
    %3 = tpu.matmul %0, %1, %cst {dimension_numbers = #tpu.dot_dimension_numbers<[1], [0], [0], [1], [0, 0, 1, 1], [], []>} : vector<16x32xf32>, vector<32x64xf32>, vector<16x64xf32> -> vector<16x64xf32>
    %4 = vector.broadcast %2 : vector<1x64xf32> to vector<16x64xf32>
    %5 = arith.addf %3, %4 : vector<16x64xf32>
    %cst_5 = arith.constant 0.000000e+00 : f32
    %6 = vector.broadcast %cst_5 : f32 to vector<16x64xf32>
    %7 = arith.maximumf %5, %6 : vector<16x64xf32>
    %c0_6 = arith.constant 0 : index
    %c0_7 = arith.constant 0 : index
    %8 = vector.load %arg5[%c0_6, %c0_7] : memref<64x32xf32, #tpu.memory_space<vmem>>, vector<64x32xf32>
    %c0_8 = arith.constant 0 : index
    %c0_9 = arith.constant 0 : index
    %9 = vector.load %arg6[%c0_8, %c0_9] : memref<1x32xf32, #tpu.memory_space<vmem>>, vector<1x32xf32>
    %cst_10 = arith.constant dense<0.000000e+00> : vector<16x32xf32>
    %10 = tpu.matmul %7, %8, %cst_10 {dimension_numbers = #tpu.dot_dimension_numbers<[1], [0], [0], [1], [0, 0, 1, 1], [], []>} : vector<16x64xf32>, vector<64x32xf32>, vector<16x32xf32> -> vector<16x32xf32>
    %11 = vector.broadcast %9 : vector<1x32xf32> to vector<16x32xf32>
    %12 = arith.addf %10, %11 : vector<16x32xf32>
    %13 = vector.extract_strided_slice %12 {offsets = [0, 0], sizes = [16, 16], strides = [1, 1]} : vector<16x32xf32> to vector<16x16xf32>
    %14 = vector.extract_strided_slice %12 {offsets = [0, 16], sizes = [16, 16], strides = [1, 1]} : vector<16x32xf32> to vector<16x16xf32>
    %c0_11 = arith.constant 0 : index
    %c0_12 = arith.constant 0 : index
    %15 = vector.load %arg2[%c0_11, %c0_12] : memref<16x16xf32, #tpu.memory_space<vmem>>, vector<16x16xf32>
    %16 = arith.subf %15, %13 : vector<16x16xf32>
    %17 = math.exp %14 : vector<16x16xf32>
    %cst_13 = arith.constant 9.99999974E-6 : f32
    %18 = vector.broadcast %cst_13 : f32 to vector<16x16xf32>
    %19 = arith.addf %17, %18 : vector<16x16xf32>
    %20 = tpu.reciprocal %19 {approx = true} : vector<16x16xf32> -> vector<16x16xf32>
    %cst_14 = arith.constant 1.83787704 : f32
    %21 = vector.broadcast %cst_14 : f32 to vector<16x16xf32>
    %22 = arith.addf %21, %14 : vector<16x16xf32>
    %23 = arith.mulf %16, %16 : vector<16x16xf32>
    %24 = arith.mulf %23, %20 : vector<16x16xf32>
    %25 = arith.addf %22, %24 : vector<16x16xf32>
    %cst_15 = arith.constant 5.000000e-01 : f32
    %26 = vector.broadcast %cst_15 : f32 to vector<16x16xf32>
    %27 = arith.mulf %26, %25 : vector<16x16xf32>
    %c0_16 = arith.constant 0 : index
    %c0_17 = arith.constant 0 : index
    %28 = vector.load %arg7[%c0_16, %c0_17] : memref<16x16xf32, #tpu.memory_space<vmem>>, vector<16x16xf32>
    tpu.vector_store %arg7[%c0_16, %c0_17], %13 {strides = array<i32>} : memref<16x16xf32, #tpu.memory_space<vmem>>, vector<16x16xf32>,
    %c0_18 = arith.constant 0 : index
    %c0_19 = arith.constant 0 : index
    %29 = vector.load %arg8[%c0_18, %c0_19] : memref<16x16xf32, #tpu.memory_space<vmem>>, vector<16x16xf32>
    tpu.vector_store %arg8[%c0_18, %c0_19], %14 {strides = array<i32>} : memref<16x16xf32, #tpu.memory_space<vmem>>, vector<16x16xf32>,
    %c0_20 = arith.constant 0 : index
    %c0_21 = arith.constant 0 : index
    %30 = vector.load %arg9[%c0_20, %c0_21] : memref<16x16xf32, #tpu.memory_space<vmem>>, vector<16x16xf32>
    tpu.vector_store %arg9[%c0_20, %c0_21], %27 {strides = array<i32>} : memref<16x16xf32, #tpu.memory_space<vmem>>, vector<16x16xf32>,
    return
  }
  func.func @transform_0(%arg0: i32) -> (i32, i32) {
    %c0_i32 = arith.constant 0 : i32
    %c0_i32_0 = arith.constant 0 : i32
    return %arg0, %c0_i32 : i32, i32
  }
  func.func @transform_1(%arg0: i32) -> (i32, i32) {
    %c0_i32 = arith.constant 0 : i32
    %c0_i32_0 = arith.constant 0 : i32
    return %arg0, %c0_i32 : i32, i32
  }
  func.func @transform_2(%arg0: i32) -> (i32, i32) {
    %c0_i32 = arith.constant 0 : i32
    %c0_i32_0 = arith.constant 0 : i32
    %c0_i32_1 = arith.constant 0 : i32
    return %c0_i32, %c0_i32_0 : i32, i32
  }
  func.func @transform_3(%arg0: i32) -> (i32, i32) {
    %c0_i32 = arith.constant 0 : i32
    %c0_i32_0 = arith.constant 0 : i32
    %c0_i32_1 = arith.constant 0 : i32
    return %c0_i32, %c0_i32_0 : i32, i32
  }
  func.func @transform_4(%arg0: i32) -> (i32, i32) {
    %c0_i32 = arith.constant 0 : i32
    %c0_i32_0 = arith.constant 0 : i32
    %c0_i32_1 = arith.constant 0 : i32
    return %c0_i32, %c0_i32_0 : i32, i32
  }
  func.func @transform_5(%arg0: i32) -> (i32, i32) {
    %c0_i32 = arith.constant 0 : i32
    %c0_i32_0 = arith.constant 0 : i32
    %c0_i32_1 = arith.constant 0 : i32
    return %c0_i32, %c0_i32_0 : i32, i32
  }
  func.func @transform_6(%arg0: i32) -> (i32, i32) {
    %c0_i32 = arith.constant 0 : i32
    %c0_i32_0 = arith.constant 0 : i32
    return %arg0, %c0_i32 : i32, i32
  }
  func.func @transform_7(%arg0: i32) -> (i32, i32) {
    %c0_i32 = arith.constant 0 : i32
    %c0_i32_0 = arith.constant 0 : i32
    return %arg0, %c0_i32 : i32, i32
  }
  func.func @transform_8(%arg0: i32) -> (i32, i32) {
    %c0_i32 = arith.constant 0 : i32
    %c0_i32_0 = arith.constant 0 : i32
    return %arg0, %c0_i32 : i32, i32
  }
}

</mosaic_0001>

<bundles_post_ra>
// kernel: decoder_forward.3
= control target key start
LH: loop header
LB: loop body
LE: loop exit
PB: predicated region body
PF: predicated region fallthrough
CT: control target
= control target key end

     0   :  { %v637_v0 = vmov 0.0   ;;  %v639_v1 = vmov 0.0   ;;  %v641_v2 = vmov 0.0   ;;  %v643_v3 = vmov 0.0   ;;  %s645_s15 = smov 0   ;;  %s737_s0 = inlined_call_operand.vmem [shape: f32[8,2,16], index: 0, kind: input, shape index: {}]   ;;  %s738_s1 = inlined_call_operand.vmem [shape: f32[2,16,64], index: 1, kind: input, shape index: {}]   ;;  %s739_s2 = inlined_call_operand.vmem [shape: f32[2,16,64], index: 2, kind: input, shape index: {}]   ;;  %s740_s3 = inlined_call_operand.vmem [shape: f32[2,1,64], index: 3, kind: input, shape index: {}]   ;;  %s741_s4 = inlined_call_operand.vmem [shape: f32[8,2,32], index: 4, kind: output, shape index: {}]  }
   0x1 LB: > { %v35_v4 = vld [vmem:[%s738_s1 + $0x8] sm:$0xff]  ;;  %v606_v6 = vmov 0.0   ;;  %v34_v7 = vld [vmem:[%s738_s1] sm:$0xff]  ;;  %s607_s22 = smov 80   ;;  %s27_s25 = ssub.s32 7, %s604_s15  ;;  %vm41_vm0 = vcmask 130048   ;;  %s604_s15 = sphi %s645_s15, %s22_s15   ;;  %v600_v3 = vphi %v643_v3, %v381_v3   ;;  %v596_v2 = vphi %v641_v2, %v375_v2   ;;  %v592_v1 = vphi %v639_v1, %v405_v1   ;;  %v588_v0 = vphi %v637_v0, %v399_v0  }
   0x2   : > { %v37_v5 = vld [vmem:[%s739_s2 + $0x8] sm:$0xff]  ;;  %483 = vmatprep.subr.mxu1 %v606_v6  ;;  %476 = vmatprep.subr.mxu0 %v606_v6  ;;  %v36_v8 = vld [vmem:[%s739_s2] sm:$0xff]  ;;  %s449_s26 = sshll.u32 %s604_s15, 1  ;;  %s678_s30 = sshll.u32 %s27_s25, 1  ;;  %vm608_vm1 = vmmov 0   ;;  %v455_v10 = vld [vmem:[%s738_s1 + $0x18] sm:$0xff] }
   0x3   : > { %39 = vrot.lane.b32.xlu0 %v600_v3, %s607_s22  ;;  %484 = vmatpush3.msra.mxu1 %v35_v4  ;;  %s29_s29 = scalar_lea.vmem %s737_s0, %s449_s26  ;;  %s32_s9 = scalar_lea.vmem %s737_s0, %s678_s30  ;;  %v454_v11 = vld [vmem:[%s738_s1 + $0x10] sm:$0xff]  ;;  %v457_v13 = vld [vmem:[%s739_s2 + $0x18] sm:$0xff]  ;;  %v453_v22 = vld [vmem:[%s740_s3] ss:$0 sm:$0xff]  ;;  %vm411_vm2 = vcmask 123904   ;;  %vm418_vm3 = vcmask 255104  }
   0x4   : > { %477 = vmatpush3.msra.mxu0 %v37_v5  ;;  %485 = vmatprep.subr.mxu1 %v606_v6  ;;  %v30_v9 = vld [vmem:[%s29_s29] sm:$0x3]  ;;  %v456_v15 = vld [vmem:[%s739_s2 + $0x10] sm:$0xff]  ;;  %s609_s21 = smov 96   ;;  %s610_s23 = smov 16  }
   0x5   : > { %478 = vmatprep.subr.mxu0 %v606_v6  ;;  %486 = vmatpush3.msra.mxu1 %v34_v7  ;;  %v33_v12 = vld [vmem:[%s32_s9] sm:$0x3]  ;;  %s611_s24 = smov 32   ;;  %s410_s28 = scalar_lea.vmem %s741_s4, %s449_s26 }
   0x6   : > { %487 = vmatprep.mubr.msk.f32.mxu1 %vm608_vm1, %v606_v6  ;;  %479 = vmatpush3.msra.mxu0 %v36_v8  ;;  %v461_v27 = vld [vmem:[%s740_s3 + $0x1] ss:$0 sm:$0xff]  ;;  %s417_s6 = scalar_lea.vmem %s741_s4, %s678_s30  ;;  %s22_s15 = sadd.s32 1, %s604_s15  }
   0x7   : > { %202 = vrot.lane.b32.xlu0 %v592_v1, %s607_s22  ;;  %488 = vmatmul.mubr.msk.f32.vlgmr.msra.gmra.mxu1 %vm41_vm0, %v30_v9  ;;  %p19_p0 = scmp.ge.s32.totalorder %s22_s15, 8  }
   0x8   : > { %497 = vmatprep.subr.mxu1 %v606_v6  ;;  %480 = vmatprep.mubr.msk.f32.mxu0 %vm608_vm1, %v606_v6 }
   0x9   : > { %490 = vmatprep.subr.mxu0 %v606_v6  ;;  %498 = vmatpush3.msra.mxu1 %v455_v10 }
   0xa   : > { %499 = vmatprep.subr.mxu1 %v606_v6  ;;  %501 = vmatprep.mubr.msk.f32.mxu1 %vm608_vm1, %v606_v6 }
   0xb   : > { %500 = vmatpush3.msra.mxu1 %v454_v11 }
   0xc   : > { %502 = vmatmul.mubr.msk.f32.vlgmr.msra.gmra.mxu1 %vm41_vm0, %v33_v12 }
  0x75   : > { %v40_v14 = vpop.permute.xlu0 %39 }
  0x76   : > { %481 = vmatmul.mubr.msk.f32.vlgmr.msra.gmra.mxu0 %vm41_vm0, %v40_v14 }
  0x77   : > { %491 = vmatpush3.msra.mxu0 %v457_v13  ;;  %494 = vmatprep.mubr.msk.f32.mxu0 %vm608_vm1, %v606_v6 }
  0x78   : > { %492 = vmatprep.subr.mxu0 %v606_v6 }
  0x79   : > { %493 = vmatpush3.msra.mxu0 %v456_v15  ;;  %v203_v16 = vpop.permute.xlu0 %202 }
  0x7a   : > { %495 = vmatmul.mubr.msk.f32.vlgmr.msra.gmra.mxu0 %vm41_vm0, %v203_v16 }
  0xc7   : > { %v183_v17 = vpop.f32.mrf.mxu1 }
  0xc9   : > { %v489_v18 = vpop.f32.mrf.mxu1 }
  0xcc   : > { %v345_v19 = vpop.f32.mrf.mxu1 }
  0xce   : > { %v503_v20 = vpop.f32.mrf.mxu1 }
 0x136   : > { %v110_v21 = vpop.f32.mrf.mxu0 }
 0x137   : > { %v184_v23 = vadd.f32 %v183_v17, %v110_v21 }
 0x138   : > { %v482_v24 = vpop.f32.mrf.mxu0 }
 0x139   : > { %v194_v25 = vadd.f32 %v453_v22, %v184_v23 }
 0x13a   : > { %v272_v26 = vpop.f32.mrf.mxu0 }
 0x13b   : > { %550 = vtanh.f32 %v194_v25  ;;  %v346_v28 = vadd.f32 %v345_v19, %v272_v26  ;;  %v462_v33 = vmul.f32 -1.442695, %v194_v25 }
 0x13c   : > { %v496_v29 = vpop.f32.mrf.mxu0 }
 0x13d   : > { %v357_v30 = vadd.f32 %v461_v27, %v346_v28 }
 0x13f   : > { %552 = vtanh.f32 %v357_v30  ;;  %v463_v34 = vmul.f32 -1.442695, %v357_v30 }
 0x140   : > { %554 = vpow2.f32 %v462_v33 }
 0x141   : > { %556 = vpow2.f32 %v463_v34 }
 0x148   : > { %v551_v31 = vpop.eup %550 }
 0x149   : > { %367 = vrot.lane.b32.xlu1 %v551_v31, %s609_s21 }
 0x14c   : > { %v553_v32 = vpop.eup %552 }
 0x14d   : > { %391 = vrot.lane.b32.xlu1 %v553_v32, %s609_s21  ;;  %v555_v35 = vpop.eup %554 }
 0x14e   : > { %v361_v36 = vadd.f32 1.0, %v555_v35  ;;  %v557_v37 = vpop.eup %556 }
 0x14f   : > { %v385_v38 = vadd.f32 1.0, %v557_v37 }
 0x150   : > { %558 = vrcp.f32 %v361_v36 }
 0x151   : > { %560 = vrcp.f32 %v385_v38 }
 0x15d   : > { %v559_v39 = vpop.eup %558 }
 0x15e   : > { %v561_v42 = vpop.eup %560  ;;  %v365_v45 = vmul.f32 %v596_v2, %v559_v39 }
 0x15f   : > { %v389_v47 = vmul.f32 %v588_v0, %v561_v42 }
 0x1bb   : > { %v368_v40 = vpop.permute.xlu1 %367 }
 0x1bc   : > { %v370_v41 = vmul.f32 %v559_v39, %v368_v40 }
 0x1be   : > { %372 = vrot.lane.b32.xlu0 %v370_v41, %s610_s23 }
 0x1bf   : > { %v392_v43 = vpop.permute.xlu1 %391 }
 0x1c0   : > { %v394_v44 = vmul.f32 %v561_v42, %v392_v43 }
 0x1c2   : > { %396 = vrot.lane.b32.xlu1 %v394_v44, %s610_s23 }
 0x230   : > { %v373_v46 = vpop.permute.xlu0 %372 }
 0x231   : > { %v375_v2 = vadd.f32 %v373_v46, %v365_v45  }
 0x233   : > { %562 = vtanh.f32 %v375_v2 }
 0x234   : > { %v397_v48 = vpop.permute.xlu1 %396 }
 0x235   : > { %v399_v0 = vadd.f32 %v397_v48, %v389_v47  }
 0x237   : > { %564 = vtanh.f32 %v399_v0 }
 0x240   : > { %v563_v49 = vpop.eup %562 }
 0x241   : > { %378 = vrot.lane.b32.xlu0 %v563_v49, %s611_s24 }
 0x244   : > { %v565_v50 = vpop.eup %564 }
 0x245   : > { %402 = vrot.lane.b32.xlu1 %v565_v50, %s611_s24 }
 0x2b3   : > { %v379_v51 = vpop.permute.xlu0 %378 }
 0x2b4   : > { %v381_v3 = vmul.f32 %v559_v39, %v379_v51  }
 0x2b6   : > { %407 = vrot.lane.b32.xlu0 %v381_v3, %s607_s22 }
 0x2b7   : > { %v403_v52 = vpop.permute.xlu1 %402 }
 0x2b8   : > { %v405_v1 = vmul.f32 %v561_v42, %v403_v52  }
 0x2ba   : > { %414 = vrot.lane.b32.xlu1 %v405_v1, %s609_s21 }
 0x328   : > { %v408_v53 = vpop.permute.xlu0 %407 }
 0x329   : > { %412 = vst.msk [vmem:[%s410_s28] sm:$0x3] %vm411_vm2, %v408_v53  ;;  %21 = sbr.rel (!%p19_p0) target bundleno = 1 (0x1), region = 50 }
 0x32c   : > { %v415_v54 = vpop.permute.xlu1 %414 }
 0x32d   : > { %419 = vst.msk [vmem:[%s417_s6] sm:$0x3] %vm418_vm3, %v415_v54 }

// kernel: decoder_forward.5
= control target key start
LH: loop header
LB: loop body
LE: loop exit
PB: predicated region body
PF: predicated region fallthrough
CT: control target
= control target key end

     0   :  { %14 = vsyncpa [#allocation3], 0  ;;  %vm41_vm0 = vcmask 261120   ;;  %s599_s0 = inlined_call_operand.vmem [shape: f32[16,32], index: 0, kind: input, shape index: {}]   ;;  %s600_s1 = inlined_call_operand.vmem [shape: f32[16,16], index: 1, kind: input, shape index: {}]   ;;  %s601_s2 = inlined_call_operand.vmem [shape: f32[32,64], index: 2, kind: input, shape index: {}]   ;;  %s602_s3 = inlined_call_operand.vmem [shape: f32[1,64], index: 3, kind: input, shape index: {}]   ;;  %s603_s4 = inlined_call_operand.vmem [shape: f32[64,32], index: 4, kind: input, shape index: {}]   ;;  %s604_s5 = inlined_call_operand.vmem [shape: f32[1,32], index: 5, kind: input, shape index: {}]   ;;  %s605_s6 = inlined_call_operand.hbm [shape: f32[16,16], index: 6, kind: output, shape index: {0}]   ;;  %s606_s7 = inlined_call_operand.hbm [shape: f32[16,16], index: 7, kind: output, shape index: {1}]   ;;  %s607_s8 = inlined_call_operand.hbm [shape: f32[16,16], index: 8, kind: output, shape index: {2}]  }
   0x1   :  { %v33_v0 = vld [vmem:[%s601_s2 + $0x18] sm:$0xff]  ;;  %v32_v1 = vld [vmem:[%s601_s2 + $0x10] sm:$0xff]  ;;  %v28_v2 = vld [vmem:[%s599_s0] sm:$0xff] }
   0x2   :  { %352 = vmatprep.subr.mxu0 %v33_v0  ;;  %v31_v3 = vld [vmem:[%s601_s2 + $0x8] sm:$0xff]  ;;  %360 = vmatprep.mubr.msk.f32.mxu0 %vm41_vm0, %v28_v2  ;;  %v132_v4 = vld [vmem:[%s603_s4 + $0x38] sm:$0xff]  ;;  %v131_v5 = vld [vmem:[%s603_s4 + $0x30] sm:$0xff] }
   0x3   :  { %353 = vmatpush3.msra.mxu0 %v33_v0  ;;  %363 = vmatprep.subr.mxu1 %v132_v4 }
   0x4   :  { %354 = vmatprep.subr.mxu0 %v32_v1 }
   0x5   :  { %15 = vsyncpa [#allocation5], 0  ;;  %355 = vmatpush3.msra.mxu0 %v32_v1  ;;  %v30_v6 = vld [vmem:[%s601_s2] sm:$0xff]  ;;  %364 = vmatpush3.msra.mxu1 %v132_v4  ;;  %v130_v7 = vld [vmem:[%s603_s4 + $0x28] sm:$0xff]  ;;  %vm140_vm1 = vcmask 523264   ;;  %vm260_vm2 = vcmask 130048  }
   0x6   :  { %356 = vmatprep.subr.mxu0 %v31_v3  ;;  %365 = vmatprep.subr.mxu1 %v131_v5  ;;  %v29_v8 = vld [vmem:[%s599_s0 + $0x8] sm:$0xff]  ;;  %v129_v9 = vld [vmem:[%s603_s4 + $0x20] sm:$0xff]  ;;  %v128_v10 = vld [vmem:[%s603_s4 + $0x18] sm:$0xff]  ;;  %s462_s15 = smov 16   ;;  %s463_s16 = smov [#allocation2]  }
   0x7   :  { %357 = vmatpush3.msra.mxu0 %v31_v3  ;;  %366 = vmatpush3.msra.mxu1 %v131_v5  ;;  %v127_v11 = vld [vmem:[%s603_s4 + $0x10] sm:$0xff]  ;;  %v126_v12 = vld [vmem:[%s603_s4 + $0x8] sm:$0xff]  ;;  %v125_v13 = vld [vmem:[%s603_s4] sm:$0xff]  ;;  %s288_s17 = sshll.u32 %s463_s16, 4  ;;  %s289_s17 = int_to_ptr.vmem [resolvable:$true] %s288_s17 }
   0x8   :  { %358 = vmatprep.subr.mxu0 %v30_v6  ;;  %367 = vmatprep.subr.mxu1 %v130_v7  ;;  %v330_v14 = vld [vmem:[%s602_s3] ss:$0 sm:$0xff]  ;;  %s461_s3 = smov 112   ;;  %v223_v36 = vld [vmem:[%s600_s1 + $0x8] sm:$0xff]  ;;  %p402_p1 = scmp.lt.s32.totalorder %s289_s17, %s289_s17 }
   0x9   :  { %359 = vmatpush3.msra.mxu0 %v30_v6  ;;  %368 = vmatpush3.msra.mxu1 %v130_v7  ;;  %v333_v21 = vld [vmem:[%s604_s5] ss:$0 sm:$0xff] }
   0xa   :  { %361 = vmatmul.mubr.msk.f32.vlgmr.msra.gmra.mxu0 %vm41_vm0, %v29_v8  ;;  %369 = vmatprep.subr.mxu1 %v129_v9  ;;  %v222_v34 = vld [vmem:[%s600_s1] sm:$0xff]  ;;  %s397_s1 = scalar_lea.vmem %s289_s17, 256 }
   0xb   :  { %370 = vmatpush3.msra.mxu1 %v129_v9  ;;  %p398_p0 = scmp.ne.s32.totalorder %s289_s17, %s397_s1  ;;  %p403_p2 = scmp.lt.s32.totalorder %s397_s1, %s397_s1 }
   0xc   :  { %371 = vmatprep.subr.mxu1 %v128_v10 }
   0xd   :  { %372 = vmatpush3.msra.mxu1 %v128_v10  ;;  %p404_p3 = por %p403_p2, %p402_p1 }
   0xe   :  { %373 = vmatprep.subr.mxu1 %v127_v11 }
   0xf   :  { %374 = vmatpush3.msra.mxu1 %v127_v11  ;;  %p405_p4 = pnand %p404_p3, %p398_p0 }
  0x10   :  { %375 = vmatprep.subr.mxu1 %v126_v12 }
  0x11   :  { %376 = vmatpush3.msra.mxu1 %v126_v12 }
  0x12   :  { %377 = vmatprep.subr.mxu1 %v125_v13 }
  0x13   :  { %378 = vmatpush3.msra.mxu1 %v125_v13 }
  0xca   :  { %v362_v15 = vpop.f32.mrf.mxu0 }
  0xcb   :  { %v120_v16 = vadd.f32 %v362_v15, %v330_v14 }
  0xcc   :  { %v114_v17 = vpop.f32.mrf.mxu0 }
  0xcd   :  { %v115_v18 = vadd.f32 %v330_v14, %v114_v17  ;;  %v124_v20 = vmax.f32 %v120_v16, 0.0 }
  0xcf   :  { %v123_v19 = vmax.f32 %v115_v18, 0.0 }
  0xd1   :  { %379 = vmatprep.mubr.msk.f32.mxu1 %vm140_vm1, %v123_v19 }
  0xd2   :  { %380 = vmatmul.mubr.msk.f32.vlgmr.msra.gmra.mxu1 %vm140_vm1, %v124_v20 }
 0x192   :  { %v381_v22 = vpop.f32.mrf.mxu1 }
 0x193   :  { %v219_v23 = vadd.f32 %v381_v22, %v333_v21 }
 0x194   :  { %v213_v24 = vpop.f32.mrf.mxu1 }
 0x195   :  { %v228_v25 = vmul.f32 1.442695, %v219_v23  ;;  %v214_v26 = vadd.f32 %v333_v21, %v213_v24  ;;  %262 = vst.msk [vmem:[#allocation2 + $0x8] sm:$0xff] %vm260_vm2, %v219_v23  ;;  %v225_v38 = vsub.f32 %v223_v36, %v219_v23 }
 0x197   :  { %v226_v27 = vmul.f32 1.442695, %v214_v26  ;;  %261 = vst.msk [vmem:[#allocation2] sm:$0xff] %vm260_vm2, %v214_v26  ;;  %389 = vpow2.f32 %v228_v25  ;;  %v224_v35 = vsub.f32 %v222_v34, %v214_v26  ;;  %v237_v41 = vmul.f32 %v225_v38, %v225_v38 }
 0x198   :  { %v234_v45 = vadd.f32 1.837877, %v214_v26 }
 0x199   :  { %391 = vpow2.f32 %v226_v27  ;;  %v236_v37 = vmul.f32 %v224_v35, %v224_v35 }
 0x1a4   :  { %v390_v28 = vpop.eup %389 }
 0x1a5   :  { %v231_v31 = vadd.f32 1e-05, %v390_v28 }
 0x1a6   :  { %v392_v29 = vpop.eup %391 }
 0x1a7   :  { %v230_v30 = vadd.f32 1e-05, %v392_v29 }
 0x1a9   :  { %393 = vrcp.f32 %v230_v30 }
 0x1aa   :  { %395 = vrcp.f32 %v231_v31 }
 0x1b6   :  { %v394_v32 = vpop.eup %393 }
 0x1b7   :  { %240 = vrot.lane.b32.xlu0 %v394_v32, %s461_s3  ;;  %v396_v33 = vpop.eup %395 }
 0x1bb   :  { %242 = vrot.lane.b32.xlu0 %v396_v33, %s461_s3 }
 0x1bf   :  { %265 = vrot.lane.b32.xlu0 %v214_v26, %s461_s3 }
 0x229   :  { %v241_v39 = vpop.permute.xlu0 %240 }
 0x22a   :  { %v246_v40 = vmul.f32 %v241_v39, %v236_v37 }
 0x22c   :  { %250 = vrot.lane.b32.xlu1 %v246_v40, %s462_s15 }
 0x22d   :  { %v243_v42 = vpop.permute.xlu0 %242 }
 0x22e   :  { %v247_v43 = vmul.f32 %v243_v42, %v237_v41 }
 0x230   :  { %252 = vrot.lane.b32.xlu1 %v247_v43, %s462_s15 }
 0x231   :  { %v266_v44 = vpop.permute.xlu0 %265 }
 0x232   :  { %271 = vst.msk [vmem:[#allocation4] sm:$0xff] %vm260_vm2, %v266_v44 }
 0x234   :  { %267 = vrot.lane.b32.xlu1 %v219_v23, %s461_s3 }
 0x235   :  { %408 = shalt.err (!%p405_p4)
}
 0x236   :  { %s464_s18 = smov 128   ;;  %s465_s19 = smov 8   ;;  %v235_v49 = vadd.f32 1.837877, %v219_v23 }
 0x237   :  { %294 = dma.vmem_to_hbm [thread:$0]  %s289_s17, 256, %s605_s6, [#allocation3], %s464_s18, %s464_s18, %s465_s19  }
 0x238   :  { %s466_s22 = smov [#allocation4]  }
 0x239   :  { %s300_s23 = sshll.u32 %s466_s22, 4  ;;  %s301_s23 = int_to_ptr.vmem [resolvable:$true] %s300_s23 }
 0x23a   :  { %s417_s24 = scalar_lea.vmem %s301_s23, 256  ;;  %p422_p6 = scmp.lt.s32.totalorder %s301_s23, %s301_s23 }
 0x23b   :  { %p418_p5 = scmp.ne.s32.totalorder %s301_s23, %s417_s24  ;;  %p423_p7 = scmp.lt.s32.totalorder %s417_s24, %s417_s24 }
 0x23d   :  { %p424_p8 = por %p423_p7, %p422_p6 }
 0x23f   :  { %p425_p9 = pnand %p424_p8, %p418_p5 }
 0x29e   :  { %v251_v46 = vpop.permute.xlu1 %250 }
 0x29f   :  { %v256_v47 = vadd.f32 %v251_v46, %v234_v45 }
 0x2a1   :  { %v258_v48 = vmul.f32 0.5, %v256_v47 }
 0x2a2   :  { %v253_v50 = vpop.permute.xlu1 %252 }
 0x2a3   :  { %v257_v51 = vadd.f32 %v253_v50, %v235_v49  ;;  %275 = vrot.lane.b32.xlu0 %v258_v48, %s461_s3 }
 0x2a5   :  { %v259_v52 = vmul.f32 0.5, %v257_v51 }
 0x2a6   :  { %v268_v53 = vpop.permute.xlu1 %267 }
 0x2a7   :  { %272 = vst.msk [vmem:[#allocation4 + $0x8] sm:$0xff] %vm260_vm2, %v268_v53  ;;  %277 = vrot.lane.b32.xlu1 %v259_v52, %s461_s3 }
 0x2a8   :  { %428 = shalt.err (!%p425_p9)
}
 0x2a9   :  { %306 = dma.vmem_to_hbm [thread:$0]  %s301_s23, 256, %s606_s7, [#allocation5], %s464_s18, %s464_s18, %s465_s19  }
 0x2aa   :  { %s467_s25 = smov [#allocation6]  }
 0x2ab   :  { %s312_s0 = sshll.u32 %s467_s25, 4  ;;  %s313_s0 = int_to_ptr.vmem [resolvable:$true] %s312_s0 }
 0x2ac   :  { %s437_s26 = scalar_lea.vmem %s313_s0, 256  ;;  %p442_p11 = scmp.lt.s32.totalorder %s313_s0, %s313_s0 }
 0x2ad   :  { %p438_p10 = scmp.ne.s32.totalorder %s313_s0, %s437_s26  ;;  %p443_p12 = scmp.lt.s32.totalorder %s437_s26, %s437_s26 }
 0x2af   :  { %p444_p13 = por %p443_p12, %p442_p11 }
 0x2b1   :  { %p445_p0 = pnand %p444_p13, %p438_p10 }
 0x315   :  { %v276_v54 = vpop.permute.xlu0 %275 }
 0x316   :  { %281 = vst.msk [vmem:[#allocation6] sm:$0xff] %vm260_vm2, %v276_v54 }
 0x319   :  { %v278_v55 = vpop.permute.xlu1 %277 }
 0x31a   :  { %282 = vst.msk [vmem:[#allocation6 + $0x8] sm:$0xff] %vm260_vm2, %v278_v55 }
 0x31b   :  { %448 = shalt.err (!%p445_p0)
}
 0x31c   :  { %318 = dma.vmem_to_hbm [thread:$0]  %s313_s0, 256, %s607_s8, [#allocation5], %s464_s18, %s464_s18, %s465_s19  }
 0x31d   :  { %457 = dma.done.wait [#allocation3], 256  }
 0x31e   :  { %458 = vsyncadd [#allocation3], 4294967040 }
 0x31f   :  { %459 = dma.done.wait [#allocation5], 512  }
 0x320   :  { %460 = vsyncadd [#allocation5], 4294966784 }
 0x321   :  { %328 = vsyncpa [#allocation3], 1 }
 0x322   :  { %329 = vsyncpa [#allocation5], 1 }

// kernel: decoder_forward.4
= control target key start
LH: loop header
LB: loop body
LE: loop exit
PB: predicated region body
PF: predicated region fallthrough
CT: control target
= control target key end

     0   :  { %v656_v0 = vmov 0.0   ;;  %v658_v1 = vmov 0.0   ;;  %v660_v2 = vmov 0.0   ;;  %v662_v3 = vmov 0.0   ;;  %s664_s15 = smov 0   ;;  %s766_s0 = inlined_call_operand.vmem [shape: f32[8,2,32], index: 0, kind: input, shape index: {}]   ;;  %s767_s1 = inlined_call_operand.vmem [shape: f32[2,32,64], index: 1, kind: input, shape index: {}]   ;;  %s768_s2 = inlined_call_operand.vmem [shape: f32[2,16,64], index: 2, kind: input, shape index: {}]   ;;  %s769_s3 = inlined_call_operand.vmem [shape: f32[2,1,64], index: 3, kind: input, shape index: {}]   ;;  %s770_s4 = inlined_call_operand.vmem [shape: f32[8,2,32], index: 4, kind: output, shape index: {}]  }
   0x1 LB: > { %v39_v4 = vld [vmem:[%s768_s2 + $0x8] sm:$0xff]  ;;  %v625_v5 = vmov 0.0   ;;  %v38_v6 = vld [vmem:[%s768_s2] sm:$0xff]  ;;  %vm626_vm0 = vmmov 0   ;;  %v464_v7 = vld [vmem:[%s768_s2 + $0x18] sm:$0xff]  ;;  %s627_s22 = smov 80   ;;  %s623_s15 = sphi %s664_s15, %s22_s15   ;;  %v619_v3 = vphi %v662_v3, %v386_v3   ;;  %v615_v2 = vphi %v660_v2, %v380_v2   ;;  %v611_v1 = vphi %v658_v1, %v410_v1   ;;  %v607_v0 = vphi %v656_v0, %v404_v0  }
   0x2   : > { %487 = vmatprep.subr.mxu1 %v625_v5  ;;  %491 = vmatprep.mubr.msk.f32.mxu1 %vm626_vm0, %v625_v5  ;;  %v463_v8 = vld [vmem:[%s768_s2 + $0x10] sm:$0xff]  ;;  %vm43_vm1 = vcmask 130048   ;;  %v37_v9 = vld [vmem:[%s767_s1 + $0x18] sm:$0xff]  ;;  %s454_s27 = sshll.u32 %s623_s15, 1  ;;  %s27_s30 = ssub.s32 7, %s623_s15  ;;  %v35_v12 = vld [vmem:[%s767_s1 + $0x8] sm:$0xff] }
   0x3   : > { %41 = vrot.lane.b32.xlu0 %v619_v3, %s627_s22  ;;  %488 = vmatpush3.msra.mxu1 %v39_v4  ;;  %v36_v11 = vld [vmem:[%s767_s1 + $0x10] sm:$0xff]  ;;  %v462_v13 = vld [vmem:[%s767_s1 + $0x38] sm:$0xff]  ;;  %s29_s11 = scalar_lea.vmem %s766_s0, %s454_s27  ;;  %s714_s12 = sshll.u32 %s27_s30, 1  ;;  %v34_v15 = vld [vmem:[%s767_s1] sm:$0xff]  ;;  %vm116_vm2 = vcmask 261120   ;;  %vm416_vm3 = vcmask 123904  }
   0x4   : > { %489 = vmatprep.subr.mxu1 %v625_v5  ;;  %505 = vmatprep.subr.mxu0 %v625_v5  ;;  %v461_v16 = vld [vmem:[%s767_s1 + $0x30] sm:$0xff]  ;;  %v30_v17 = vld [vmem:[%s29_s11] sm:$0x3]  ;;  %v460_v18 = vld [vmem:[%s767_s1 + $0x28] sm:$0xff]  ;;  %s32_s23 = scalar_lea.vmem %s766_s0, %s714_s12  ;;  %s628_s5 = smov 96   ;;  %vm423_vm4 = vcmask 255104  }
   0x5   : > { %490 = vmatpush3.msra.mxu1 %v38_v6  ;;  %506 = vmatpush3.msra.mxu0 %v464_v7  ;;  %v459_v19 = vld [vmem:[%s767_s1 + $0x20] sm:$0xff]  ;;  %s629_s6 = smov 16   ;;  %s630_s7 = smov 32  }
   0x6   : > { %494 = vmatprep.subr.mxu1 %v625_v5  ;;  %507 = vmatprep.subr.mxu0 %v625_v5  ;;  %v33_v20 = vld [vmem:[%s32_s23] sm:$0x3]  ;;  %s415_s10 = scalar_lea.vmem %s770_s4, %s454_s27  ;;  %s422_s14 = scalar_lea.vmem %s770_s4, %s714_s12 }
   0x7   : > { %207 = vrot.lane.b32.xlu0 %v611_v1, %s627_s22  ;;  %508 = vmatpush3.msra.mxu0 %v463_v8  ;;  %v458_v26 = vld [vmem:[%s769_s3] ss:$0 sm:$0xff]  ;;  %v468_v31 = vld [vmem:[%s769_s3 + $0x1] ss:$0 sm:$0xff]  ;;  %s22_s15 = sadd.s32 1, %s623_s15  }
   0x8   : > { %509 = vmatprep.mubr.msk.f32.mxu0 %vm626_vm0, %v625_v5  ;;  %512 = vmatprep.subr.mxu0 %v625_v5  ;;  %p19_p0 = scmp.ge.s32.totalorder %s22_s15, 8  }
  0x75   : > { %v42_v10 = vpop.permute.xlu0 %41 }
  0x76   : > { %492 = vmatmul.mubr.msk.f32.vlgmr.msra.gmra.mxu1 %vm43_vm1, %v42_v10 }
  0x77   : > { %495 = vmatpush3.msra.mxu1 %v37_v9  ;;  %502 = vmatprep.mubr.msk.f32.mxu1 %vm626_vm0, %v625_v5 }
  0x78   : > { %496 = vmatprep.subr.mxu1 %v625_v5 }
  0x79   : > { %497 = vmatpush3.msra.mxu1 %v36_v11  ;;  %v208_v14 = vpop.permute.xlu0 %207 }
  0x7a   : > { %498 = vmatprep.subr.mxu1 %v625_v5  ;;  %510 = vmatmul.mubr.msk.f32.vlgmr.msra.gmra.mxu0 %vm43_vm1, %v208_v14 }
  0x7b   : > { %499 = vmatpush3.msra.mxu1 %v35_v12  ;;  %513 = vmatpush3.msra.mxu0 %v462_v13 }
  0x7c   : > { %500 = vmatprep.subr.mxu1 %v625_v5  ;;  %514 = vmatprep.subr.mxu0 %v625_v5 }
  0x7d   : > { %501 = vmatpush3.msra.mxu1 %v34_v15  ;;  %515 = vmatpush3.msra.mxu0 %v461_v16 }
  0x7e   : > { %503 = vmatmul.mubr.msk.f32.vlgmr.msra.gmra.mxu1 %vm116_vm2, %v30_v17  ;;  %516 = vmatprep.subr.mxu0 %v625_v5 }
  0x7f   : > { %517 = vmatpush3.msra.mxu0 %v460_v18  ;;  %520 = vmatprep.mubr.msk.f32.mxu0 %vm626_vm0, %v625_v5 }
  0x80   : > { %518 = vmatprep.subr.mxu0 %v625_v5 }
  0x81   : > { %519 = vmatpush3.msra.mxu0 %v459_v19 }
  0x82   : > { %521 = vmatmul.mubr.msk.f32.vlgmr.msra.gmra.mxu0 %vm116_vm2, %v33_v20 }
 0x136   : > { %v112_v21 = vpop.f32.mrf.mxu1 }
 0x138   : > { %v493_v22 = vpop.f32.mrf.mxu1 }
 0x13a   : > { %v277_v23 = vpop.f32.mrf.mxu0 }
 0x13c   : > { %v511_v24 = vpop.f32.mrf.mxu0 }
 0x13e   : > { %v186_v25 = vpop.f32.mrf.mxu1 }
 0x13f   : > { %v187_v27 = vadd.f32 %v186_v25, %v112_v21 }
 0x140   : > { %v504_v28 = vpop.f32.mrf.mxu1 }
 0x141   : > { %v197_v29 = vadd.f32 %v458_v26, %v187_v27 }
 0x142   : > { %v350_v30 = vpop.f32.mrf.mxu0 }
 0x143   : > { %569 = vtanh.f32 %v197_v29  ;;  %v351_v32 = vadd.f32 %v350_v30, %v277_v23  ;;  %v469_v37 = vmul.f32 -1.442695, %v197_v29 }
 0x144   : > { %v522_v33 = vpop.f32.mrf.mxu0 }
 0x145   : > { %v362_v34 = vadd.f32 %v468_v31, %v351_v32 }
 0x147   : > { %571 = vtanh.f32 %v362_v34  ;;  %v470_v38 = vmul.f32 -1.442695, %v362_v34 }
 0x148   : > { %573 = vpow2.f32 %v469_v37 }
 0x149   : > { %575 = vpow2.f32 %v470_v38 }
 0x150   : > { %v570_v35 = vpop.eup %569 }
 0x151   : > { %372 = vrot.lane.b32.xlu1 %v570_v35, %s628_s5 }
 0x154   : > { %v572_v36 = vpop.eup %571 }
 0x155   : > { %396 = vrot.lane.b32.xlu1 %v572_v36, %s628_s5  ;;  %v574_v39 = vpop.eup %573 }
 0x156   : > { %v366_v40 = vadd.f32 1.0, %v574_v39  ;;  %v576_v41 = vpop.eup %575 }
 0x157   : > { %v390_v42 = vadd.f32 1.0, %v576_v41 }
 0x158   : > { %577 = vrcp.f32 %v366_v40 }
 0x159   : > { %579 = vrcp.f32 %v390_v42 }
 0x165   : > { %v578_v43 = vpop.eup %577 }
 0x166   : > { %v580_v46 = vpop.eup %579  ;;  %v370_v49 = vmul.f32 %v615_v2, %v578_v43 }
 0x167   : > { %v394_v51 = vmul.f32 %v607_v0, %v580_v46 }
 0x1c3   : > { %v373_v44 = vpop.permute.xlu1 %372 }
 0x1c4   : > { %v375_v45 = vmul.f32 %v578_v43, %v373_v44 }
 0x1c6   : > { %377 = vrot.lane.b32.xlu0 %v375_v45, %s629_s6 }
 0x1c7   : > { %v397_v47 = vpop.permute.xlu1 %396 }
 0x1c8   : > { %v399_v48 = vmul.f32 %v580_v46, %v397_v47 }
 0x1ca   : > { %401 = vrot.lane.b32.xlu1 %v399_v48, %s629_s6 }
 0x238   : > { %v378_v50 = vpop.permute.xlu0 %377 }
 0x239   : > { %v380_v2 = vadd.f32 %v378_v50, %v370_v49  }
 0x23b   : > { %581 = vtanh.f32 %v380_v2 }
 0x23c   : > { %v402_v52 = vpop.permute.xlu1 %401 }
 0x23d   : > { %v404_v0 = vadd.f32 %v402_v52, %v394_v51  }
 0x23f   : > { %583 = vtanh.f32 %v404_v0 }
 0x248   : > { %v582_v53 = vpop.eup %581 }
 0x249   : > { %383 = vrot.lane.b32.xlu0 %v582_v53, %s630_s7 }
 0x24c   : > { %v584_v54 = vpop.eup %583 }
 0x24d   : > { %407 = vrot.lane.b32.xlu1 %v584_v54, %s630_s7 }
 0x2bb   : > { %v384_v55 = vpop.permute.xlu0 %383 }
 0x2bc   : > { %v386_v3 = vmul.f32 %v578_v43, %v384_v55  }
 0x2be   : > { %412 = vrot.lane.b32.xlu0 %v386_v3, %s627_s22 }
 0x2bf   : > { %v408_v56 = vpop.permute.xlu1 %407 }
 0x2c0   : > { %v410_v1 = vmul.f32 %v580_v46, %v408_v56  }
 0x2c2   : > { %419 = vrot.lane.b32.xlu1 %v410_v1, %s628_s5 }
 0x330   : > { %v413_v57 = vpop.permute.xlu0 %412 }
 0x331   : > { %417 = vst.msk [vmem:[%s415_s10] sm:$0x3] %vm416_vm3, %v413_v57  ;;  %21 = sbr.rel (!%p19_p0) target bundleno = 1 (0x1), region = 50 }
 0x334   : > { %v420_v58 = vpop.permute.xlu1 %419 }
 0x335   : > { %424 = vst.msk [vmem:[%s422_s14] sm:$0x3] %vm423_vm4, %v420_v58 }

</bundles_post_ra>
